<compile_context>
chip_gen: v6e
topology: v6e:2x2x1
jax: 0.10.0
libtpu: 0.0.40
codegen_flags: <defaults>
</compile_context>

<pallas_src>
import functools

import jax
import jax.numpy as jnp
from jax import lax
from jax.experimental import pallas as pl
from jax.experimental.pallas import tpu as pltpu


def compute_padding_same(in_size, out_size, kernel, stride):
    res = (in_size - 1) * stride - out_size + kernel
    out_padding = 0 if res % 2 == 0 else 1
    padding = (res + out_padding) // 2
    return int(padding), int(out_padding)


def _phase_taps(kernel, stride, pad):
    """Per output phase r in [0, stride): list of (k, shift) kernel taps.

    Output position o = stride*q + r receives x[q + shift] * w[k] for each
    (k, shift) in the list (derived from o = i*stride - pad + k)."""
    taps = []
    for r in range(stride):
        t = []
        for k in range(kernel):
            if (k - r - pad) % stride == 0:
                t.append((k, (r + pad - k) // stride))
        taps.append(t)
    return taps


def _vmem_budget_bytes():
    """Generation-aware VMEM cap: ~75% of per-core capacity (48 MiB fallback)."""
    try:
        cap = int(pltpu.get_tpu_info().vmem_capacity_bytes)
    except Exception:
        cap = 64 * 1024 * 1024
    return max(32 * 1024 * 1024, (cap * 3) // 4)


def _make_kernel(phase_plan, *, bh, qw, cout, pad_top, pad_left):
    """phase_plan: tuple over S*S phases of ((sy, ((tap_idx, sx), ...)), ...)."""
    row_shifts = sorted({sy for phase in phase_plan for (sy, _) in phase})

    def kernel(x_ref, w_ref, b_ref, o_ref):
        # x_ref: (Hp, Cin, Wp)      compute dtype   (one sample, resident)
        # w_ref: (K*K, Cout, Cin)   compute dtype   (all taps, resident)
        # b_ref: (Cout, 1)          f32
        # o_ref: (BH, S*S*Cout, QW) out dtype
        row0 = pl.program_id(1) * bh
        bias = b_ref[...]                                    # (Cout, 1) f32

        def body(q, carry):
            out_row = row0 + q
            # Load each needed input row once; reuse across phases and taps.
            rows = {
                sy: x_ref[pl.ds(out_row + sy + pad_top, 1)][0]   # (Cin, Wp)
                for sy in row_shifts
            }
            for p, htaps in enumerate(phase_plan):
                acc = jnp.zeros((cout, qw), jnp.float32)
                for sy, wtaps in htaps:
                    row = rows[sy]
                    for tap_idx, sx in wtaps:
                        xs = row[:, pad_left + sx: pad_left + sx + qw]  # (Cin,QW)
                        acc = acc + jnp.dot(
                            w_ref[tap_idx], xs,
                            preferred_element_type=jnp.float32)
                o_ref[pl.ds(q, 1), p * cout:(p + 1) * cout, :] = (
                    (acc + bias).astype(o_ref.dtype)[None])
            return carry

        lax.fori_loop(0, bh, body, 0)

    return kernel


@functools.partial(
    jax.jit,
    static_argnames=("out_size", "kernel", "stride", "compute_dtype", "out_dtype"))
def conv_transpose2d_same(x, weight, bias, *, out_size, kernel, stride,
                          compute_dtype=jnp.bfloat16, out_dtype=None):
    """x: (N, Cin, H, W); weight: (Cin, Cout, K, K) [PyTorch ConvTranspose2d];
    bias: (Cout,). Returns (N, Cout, out_h, out_w)."""
    n, cin, h, w = x.shape
    cout = weight.shape[1]
    k, s = kernel, stride
    oh, ow = out_size
    out_dtype = x.dtype if out_dtype is None else out_dtype

    pad_h, _ = compute_padding_same(h, oh, k, s)
    pad_w, _ = compute_padding_same(w, ow, k, s)

    taps_h = _phase_taps(k, s, pad_h)
    taps_w = _phase_taps(k, s, pad_w)
    qh = -(-oh // s)           # per-phase output rows
    qw = -(-ow // s)           # per-phase output cols
    n_phase = s * s

    # Row-block grid axis: keep >= 2 parallel grid steps for v7x megacore when
    # the batch alone does not provide them.
    rb = 1 if n >= 2 else min(2, qh)
    bh = -(-qh // rb)
    qh_pad = rb * bh

    # Zero-pad the (non-dilated) input so every shifted row/col window used by
    # the kernel is a plain in-bounds static slice.
    sh = [0] + [sft for t in taps_h for (_, sft) in t]
    sw = [0] + [sft for t in taps_w for (_, sft) in t]
    pad_top, pad_bot = max(0, -min(sh)), max(0, max(sh) + qh_pad - h)
    pad_lft, pad_rgt = max(0, -min(sw)), max(0, max(sw) + qw - w)
    hp = h + pad_top + pad_bot
    wp = w + pad_lft + pad_rgt

    # Input is read from HBM exactly once, in a (N, Hp, Cin, Wp) layout so a
    # per-row tap view is a plain 2-D (Cin, QW) slice inside the kernel.
    xp = jnp.pad(jnp.transpose(x, (0, 2, 1, 3)),
                 ((0, 0), (pad_top, pad_bot), (0, 0), (pad_lft, pad_rgt))
                 ).astype(compute_dtype)

    # (K*K, Cout, Cin) tap-major weight matrix; taps a phase never uses are
    # simply never loaded (no zero-padded rows, no wasted MACs).
    wmat = jnp.transpose(weight, (2, 3, 1, 0)).reshape(k * k, cout, cin)
    wmat = wmat.astype(compute_dtype)
    b2 = bias.reshape(cout, 1).astype(jnp.float32)

    # Static per-phase tap plan (trace-time unrolled inside the kernel).
    phase_plan = []
    for ry in range(s):
        for rx in range(s):
            htaps = []
            for (ky, sy) in taps_h[ry]:
                wtaps = tuple((ky * k + kx, sx) for (kx, sx) in taps_w[rx])
                htaps.append((sy, wtaps))
            phase_plan.append(tuple(htaps))
    phase_plan = tuple(phase_plan)
    total_taps = sum(len(wt) for ph in phase_plan for (_, wt) in ph)

    kern = _make_kernel(phase_plan, bh=bh, qw=qw, cout=cout,
                        pad_top=pad_top, pad_left=pad_lft)

    # --- VMEM budgeting (double-buffered streams, generation-aware cap) ---
    esize = jnp.dtype(compute_dtype).itemsize
    osize = jnp.dtype(out_dtype).itemsize
    x_blk = hp * cin * wp * esize
    w_blk = k * k * cout * cin * esize
    o_blk = bh * n_phase * cout * qw * osize
    vmem_limit = int(min(_vmem_budget_bytes(),
                         max(16 * 1024 * 1024,
                             3 * (x_blk + w_blk + o_blk) + (2 << 20))))

    # CostEstimate with the true (non-replicated) HBM traffic.
    flops = 2 * n * qh_pad * qw * cout * cin * total_taps
    bytes_accessed = (xp.size * esize + wmat.size * esize + b2.size * 4
                      + n * qh_pad * n_phase * cout * qw * osize)

    out = pl.pallas_call(
        kern,
        out_shape=jax.ShapeDtypeStruct((n, qh_pad, n_phase * cout, qw), out_dtype),
        grid_spec=pltpu.PrefetchScalarGridSpec(
            num_scalar_prefetch=0,
            grid=(n, rb),
            in_specs=[
                pl.BlockSpec((None, hp, cin, wp), lambda i, j: (i, 0, 0, 0)),
                pl.BlockSpec((k * k, cout, cin), lambda i, j: (0, 0, 0)),
                pl.BlockSpec((cout, 1), lambda i, j: (0, 0)),
            ],
            out_specs=pl.BlockSpec((None, bh, n_phase * cout, qw),
                                   lambda i, j: (i, j, 0, 0)),
        ),
        compiler_params=pltpu.CompilerParams(
            dimension_semantics=("parallel", "parallel"),
            vmem_limit_bytes=vmem_limit,
        ),
        cost_estimate=pl.CostEstimate(
            flops=int(flops), transcendentals=0,
            bytes_accessed=int(bytes_accessed)),
    )(xp, wmat, b2)

    # Depth-to-space glue: (N, QH, S, S, Cout, QW) -> (N, Cout, OH, OW).
    # Single XLA transpose pass; kept outside the kernel to keep the kernel's
    # stores lane-dense (strided lane scatters would be far worse).
    out = out[:, :qh].reshape(n, qh, s, s, cout, qw)
    out = jnp.transpose(out, (0, 4, 1, 2, 5, 3)).reshape(n, cout, qh * s, qw * s)
    return out[:, :, :oh, :ow]


def _reference(x, weight, bias, out_size, kernel, stride, cast_dtype=None):
    """Pure-JAX ConvTranspose2d reference (lhs-dilated conv, flipped kernel)."""
    oh, ow = out_size
    k, s = kernel, stride
    pad_h, opad_h = compute_padding_same(x.shape[2], oh, k, s)
    pad_w, opad_w = compute_padding_same(x.shape[3], ow, k, s)
    if cast_dtype is not None:
        x = x.astype(cast_dtype).astype(jnp.float32)
        weight = weight.astype(cast_dtype).astype(jnp.float32)
    w_conv = jnp.transpose(weight[:, :, ::-1, ::-1], (1, 0, 2, 3))  # (Cout,Cin,K,K)
    out = lax.conv_general_dilated(
        x, w_conv,
        window_strides=(1, 1),
        padding=((k - 1 - pad_h, k - 1 - pad_h + opad_h),
                 (k - 1 - pad_w, k - 1 - pad_w + opad_w)),
        lhs_dilation=(s, s),
        dimension_numbers=("NCHW", "OIHW", "NCHW"),
        precision=lax.Precision.HIGHEST,
    )
    return out + bias[None, :, None, None]


if __name__ == "__main__":
    key = jax.random.PRNGKey(0)

    # ---- Config 1: typical GAN 2x upsampling block (bf16 compute path) ----
    N, Cin, Cout = 2, 4, 8
    in_size, out_size, K, S = (8, 8), (16, 16), 4, 2
    k1, k2, k3, key = jax.random.split(key, 4)
    x = jax.random.normal(k1, (N, Cin) + in_size, jnp.float32)
    # PyTorch ConvTranspose2d weight layout: (in_channels, out_channels, kH, kW)
    weight = jax.random.normal(k2, (Cin, Cout, K, K), jnp.float32) * 0.1
    bias = jax.random.normal(k3, (Cout,), jnp.float32) * 0.1

    y = conv_transpose2d_same(x, weight, bias, out_size=out_size,
                              kernel=K, stride=S, compute_dtype=jnp.bfloat16)
    y = jax.block_until_ready(y)
    assert y.shape == (N, Cout) + out_size, y.shape

    ref_bf16 = _reference(x, weight, bias, out_size, K, S, cast_dtype=jnp.bfloat16)
    ref_f32 = _reference(x, weight, bias, out_size, K, S)
    err1 = float(jnp.max(jnp.abs(y - ref_bf16)))
    assert jnp.allclose(y, ref_bf16, atol=1e-2, rtol=1e-2), err1
    err1f = float(jnp.max(jnp.abs(y - ref_f32)))
    assert jnp.allclose(y, ref_f32, atol=5e-2, rtol=5e-2), err1f

    # ---- Config 2: odd config (output_padding=1, K not divisible by S,
    #      non-uniform taps per phase, N=1 -> row-block grid axis), f32 path ----
    N2, Cin2, Cout2 = 1, 3, 5
    in2, out2, K2, S2 = (7, 7), (14, 14), 3, 2
    k1, k2, k3, key = jax.random.split(key, 4)
    x2 = jax.random.normal(k1, (N2, Cin2) + in2, jnp.float32)
    w2 = jax.random.normal(k2, (Cin2, Cout2, K2, K2), jnp.float32) * 0.1
    b2 = jax.random.normal(k3, (Cout2,), jnp.float32) * 0.1

    y2 = conv_transpose2d_same(x2, w2, b2, out_size=out2, kernel=K2, stride=S2,
                               compute_dtype=jnp.float32)
    y2 = jax.block_until_ready(y2)
    assert y2.shape == (N2, Cout2) + out2, y2.shape
    ref2 = _reference(x2, w2, b2, out2, K2, S2)
    err2 = float(jnp.max(jnp.abs(y2 - ref2)))
    assert jnp.allclose(y2, ref2, atol=2e-2, rtol=2e-2), err2

    print("KERNEL_OK")
</pallas_src>

<mosaic_0001>
module attributes {stable_mosaic.version = 11 : i64} {
  func.func @kernel(%arg0: i32, %arg1: i32, %arg2: memref<1x10x4x10xbf16, #tpu.memory_space<vmem>>, %arg3: memref<16x8x4xbf16, #tpu.memory_space<vmem>>, %arg4: memref<8x1xf32, #tpu.memory_space<vmem>>, %arg5: memref<1x8x32x8xf32, #tpu.memory_space<vmem>>) attributes {dimension_semantics = [#tpu.dimension_semantics<parallel>, #tpu.dimension_semantics<parallel>], iteration_bounds = array<i64: 2, 1>, scalar_prefetch = 0 : i64, scratch_operands = 0 : i64, tpu.core_type = #tpu.core_type<tc>, window_params = [{transform_indices = @transform_0, window_bounds = array<i64: 1, 10, 4, 10>}, {pipeline_mode = #tpu.pipeline_mode<synchronous>, transform_indices = @transform_1, window_bounds = array<i64: 16, 8, 4>}, {pipeline_mode = #tpu.pipeline_mode<synchronous>, transform_indices = @transform_2, window_bounds = array<i64: 8, 1>}, {transform_indices = @transform_3, window_bounds = array<i64: 1, 8, 32, 8>}]} {
    %c8_i32 = arith.constant 8 : i32
    %0 = arith.muli %arg1, %c8_i32 : i32
    %c0 = arith.constant 0 : index
    %c0_0 = arith.constant 0 : index
    %1 = vector.load %arg4[%c0, %c0_0] : memref<8x1xf32, #tpu.memory_space<vmem>>, vector<8x1xf32>
    %c0_i32 = arith.constant 0 : i32
    %c8_i32_1 = arith.constant 8 : i32
    %2 = arith.addi %c0_i32, %c8_i32_1 : i32
    %c1_i32 = arith.constant 1 : i32
    scf.for %arg6 = %c0_i32 to %2 step %c1_i32  : i32 {
      %3 = arith.addi %0, %arg6 : i32
      %c-1_i32 = arith.constant -1 : i32
      %4 = arith.addi %3, %c-1_i32 : i32
      %c1_i32_3 = arith.constant 1 : i32
      %5 = arith.addi %4, %c1_i32_3 : i32
      %c0_4 = arith.constant 0 : index
      %6 = arith.index_cast %5 : i32 to index
      %c0_5 = arith.constant 0 : index
      %c0_6 = arith.constant 0 : index
      %7 = vector.load %arg2[%c0_4, %6, %c0_5, %c0_6] : memref<1x10x4x10xbf16, #tpu.memory_space<vmem>>, vector<1x1x4x10xbf16>
      %8 = vector.shape_cast %7 : vector<1x1x4x10xbf16> to vector<1x4x10xbf16>
      %9 = vector.shape_cast %8 : vector<1x4x10xbf16> to vector<4x10xbf16>
      %c0_i32_7 = arith.constant 0 : i32
      %10 = arith.addi %3, %c0_i32_7 : i32
      %c1_i32_8 = arith.constant 1 : i32
      %11 = arith.addi %10, %c1_i32_8 : i32
      %c0_9 = arith.constant 0 : index
      %12 = arith.index_cast %11 : i32 to index
      %c0_10 = arith.constant 0 : index
      %c0_11 = arith.constant 0 : index
      %13 = vector.load %arg2[%c0_9, %12, %c0_10, %c0_11] : memref<1x10x4x10xbf16, #tpu.memory_space<vmem>>, vector<1x1x4x10xbf16>
      %14 = vector.shape_cast %13 : vector<1x1x4x10xbf16> to vector<1x4x10xbf16>
      %15 = vector.shape_cast %14 : vector<1x4x10xbf16> to vector<4x10xbf16>
      %c1_i32_12 = arith.constant 1 : i32
      %16 = arith.addi %3, %c1_i32_12 : i32
      %c1_i32_13 = arith.constant 1 : i32
      %17 = arith.addi %16, %c1_i32_13 : i32
      %c0_14 = arith.constant 0 : index
      %18 = arith.index_cast %17 : i32 to index
      %c0_15 = arith.constant 0 : index
      %c0_16 = arith.constant 0 : index
      %19 = vector.load %arg2[%c0_14, %18, %c0_15, %c0_16] : memref<1x10x4x10xbf16, #tpu.memory_space<vmem>>, vector<1x1x4x10xbf16>
      %20 = vector.shape_cast %19 : vector<1x1x4x10xbf16> to vector<1x4x10xbf16>
      %21 = vector.shape_cast %20 : vector<1x4x10xbf16> to vector<4x10xbf16>
      %cst = arith.constant 0.000000e+00 : f32
      %22 = vector.broadcast %cst : f32 to vector<8x8xf32>
      %23 = vector.extract_strided_slice %15 {offsets = [0, 1], sizes = [4, 8], strides = [1, 1]} : vector<4x10xbf16> to vector<4x8xbf16>
      %c5 = arith.constant 5 : index
      %c0_17 = arith.constant 0 : index
      %c0_18 = arith.constant 0 : index
      %24 = vector.load %arg3[%c5, %c0_17, %c0_18] : memref<16x8x4xbf16, #tpu.memory_space<vmem>>, vector<1x8x4xbf16>
      %25 = vector.shape_cast %24 : vector<1x8x4xbf16> to vector<8x4xbf16>
      %cst_19 = arith.constant dense<0.000000e+00> : vector<8x8xf32>
      %26 = tpu.matmul %25, %23, %cst_19 {dimension_numbers = #tpu.dot_dimension_numbers<[1], [0], [0], [1], [0, 0, 1, 1], [], []>} : vector<8x4xbf16>, vector<4x8xbf16>, vector<8x8xf32> -> vector<8x8xf32>
      %27 = arith.addf %22, %26 : vector<8x8xf32>
      %28 = vector.extract_strided_slice %15 {offsets = [0, 0], sizes = [4, 8], strides = [1, 1]} : vector<4x10xbf16> to vector<4x8xbf16>
      %c7 = arith.constant 7 : index
      %c0_20 = arith.constant 0 : index
      %c0_21 = arith.constant 0 : index
      %29 = vector.load %arg3[%c7, %c0_20, %c0_21] : memref<16x8x4xbf16, #tpu.memory_space<vmem>>, vector<1x8x4xbf16>
      %30 = vector.shape_cast %29 : vector<1x8x4xbf16> to vector<8x4xbf16>
      %cst_22 = arith.constant dense<0.000000e+00> : vector<8x8xf32>
      %31 = tpu.matmul %30, %28, %cst_22 {dimension_numbers = #tpu.dot_dimension_numbers<[1], [0], [0], [1], [0, 0, 1, 1], [], []>} : vector<8x4xbf16>, vector<4x8xbf16>, vector<8x8xf32> -> vector<8x8xf32>
      %32 = arith.addf %27, %31 : vector<8x8xf32>
      %33 = vector.extract_strided_slice %9 {offsets = [0, 1], sizes = [4, 8], strides = [1, 1]} : vector<4x10xbf16> to vector<4x8xbf16>
      %c13 = arith.constant 13 : index
      %c0_23 = arith.constant 0 : index
      %c0_24 = arith.constant 0 : index
      %34 = vector.load %arg3[%c13, %c0_23, %c0_24] : memref<16x8x4xbf16, #tpu.memory_space<vmem>>, vector<1x8x4xbf16>
      %35 = vector.shape_cast %34 : vector<1x8x4xbf16> to vector<8x4xbf16>
      %cst_25 = arith.constant dense<0.000000e+00> : vector<8x8xf32>
      %36 = tpu.matmul %35, %33, %cst_25 {dimension_numbers = #tpu.dot_dimension_numbers<[1], [0], [0], [1], [0, 0, 1, 1], [], []>} : vector<8x4xbf16>, vector<4x8xbf16>, vector<8x8xf32> -> vector<8x8xf32>
      %37 = arith.addf %32, %36 : vector<8x8xf32>
      %38 = vector.extract_strided_slice %9 {offsets = [0, 0], sizes = [4, 8], strides = [1, 1]} : vector<4x10xbf16> to vector<4x8xbf16>
      %c15 = arith.constant 15 : index
      %c0_26 = arith.constant 0 : index
      %c0_27 = arith.constant 0 : index
      %39 = vector.load %arg3[%c15, %c0_26, %c0_27] : memref<16x8x4xbf16, #tpu.memory_space<vmem>>, vector<1x8x4xbf16>
      %40 = vector.shape_cast %39 : vector<1x8x4xbf16> to vector<8x4xbf16>
      %cst_28 = arith.constant dense<0.000000e+00> : vector<8x8xf32>
      %41 = tpu.matmul %40, %38, %cst_28 {dimension_numbers = #tpu.dot_dimension_numbers<[1], [0], [0], [1], [0, 0, 1, 1], [], []>} : vector<8x4xbf16>, vector<4x8xbf16>, vector<8x8xf32> -> vector<8x8xf32>
      %42 = arith.addf %37, %41 : vector<8x8xf32>
      %43 = vector.broadcast %1 : vector<8x1xf32> to vector<8x8xf32>
      %44 = arith.addf %42, %43 : vector<8x8xf32>
      %45 = vector.shape_cast %44 : vector<8x8xf32> to vector<1x8x8xf32>
      %c0_29 = arith.constant 0 : index
      %46 = arith.index_cast %arg6 : i32 to index
      %c0_30 = arith.constant 0 : index
      %c0_31 = arith.constant 0 : index
      %47 = vector.load %arg5[%c0_29, %46, %c0_30, %c0_31] : memref<1x8x32x8xf32, #tpu.memory_space<vmem>>, vector<1x1x8x8xf32>
      %48 = vector.shape_cast %47 : vector<1x1x8x8xf32> to vector<1x8x8xf32>
      %49 = vector.shape_cast %45 : vector<1x8x8xf32> to vector<1x1x8x8xf32>
      tpu.vector_store %arg5[%c0_29, %46, %c0_30, %c0_31], %49 {strides = array<i32>} : memref<1x8x32x8xf32, #tpu.memory_space<vmem>>, vector<1x1x8x8xf32>,
      %cst_32 = arith.constant 0.000000e+00 : f32
      %50 = vector.broadcast %cst_32 : f32 to vector<8x8xf32>
      %51 = vector.extract_strided_slice %15 {offsets = [0, 2], sizes = [4, 8], strides = [1, 1]} : vector<4x10xbf16> to vector<4x8xbf16>
      %c4 = arith.constant 4 : index
      %c0_33 = arith.constant 0 : index
      %c0_34 = arith.constant 0 : index
      %52 = vector.load %arg3[%c4, %c0_33, %c0_34] : memref<16x8x4xbf16, #tpu.memory_space<vmem>>, vector<1x8x4xbf16>
      %53 = vector.shape_cast %52 : vector<1x8x4xbf16> to vector<8x4xbf16>
      %cst_35 = arith.constant dense<0.000000e+00> : vector<8x8xf32>
      %54 = tpu.matmul %53, %51, %cst_35 {dimension_numbers = #tpu.dot_dimension_numbers<[1], [0], [0], [1], [0, 0, 1, 1], [], []>} : vector<8x4xbf16>, vector<4x8xbf16>, vector<8x8xf32> -> vector<8x8xf32>
      %55 = arith.addf %50, %54 : vector<8x8xf32>
      %56 = vector.extract_strided_slice %15 {offsets = [0, 1], sizes = [4, 8], strides = [1, 1]} : vector<4x10xbf16> to vector<4x8xbf16>
      %c6 = arith.constant 6 : index
      %c0_36 = arith.constant 0 : index
      %c0_37 = arith.constant 0 : index
      %57 = vector.load %arg3[%c6, %c0_36, %c0_37] : memref<16x8x4xbf16, #tpu.memory_space<vmem>>, vector<1x8x4xbf16>
      %58 = vector.shape_cast %57 : vector<1x8x4xbf16> to vector<8x4xbf16>
      %cst_38 = arith.constant dense<0.000000e+00> : vector<8x8xf32>
      %59 = tpu.matmul %58, %56, %cst_38 {dimension_numbers = #tpu.dot_dimension_numbers<[1], [0], [0], [1], [0, 0, 1, 1], [], []>} : vector<8x4xbf16>, vector<4x8xbf16>, vector<8x8xf32> -> vector<8x8xf32>
      %60 = arith.addf %55, %59 : vector<8x8xf32>
      %61 = vector.extract_strided_slice %9 {offsets = [0, 2], sizes = [4, 8], strides = [1, 1]} : vector<4x10xbf16> to vector<4x8xbf16>
      %c12 = arith.constant 12 : index
      %c0_39 = arith.constant 0 : index
      %c0_40 = arith.constant 0 : index
      %62 = vector.load %arg3[%c12, %c0_39, %c0_40] : memref<16x8x4xbf16, #tpu.memory_space<vmem>>, vector<1x8x4xbf16>
      %63 = vector.shape_cast %62 : vector<1x8x4xbf16> to vector<8x4xbf16>
      %cst_41 = arith.constant dense<0.000000e+00> : vector<8x8xf32>
      %64 = tpu.matmul %63, %61, %cst_41 {dimension_numbers = #tpu.dot_dimension_numbers<[1], [0], [0], [1], [0, 0, 1, 1], [], []>} : vector<8x4xbf16>, vector<4x8xbf16>, vector<8x8xf32> -> vector<8x8xf32>
      %65 = arith.addf %60, %64 : vector<8x8xf32>
      %66 = vector.extract_strided_slice %9 {offsets = [0, 1], sizes = [4, 8], strides = [1, 1]} : vector<4x10xbf16> to vector<4x8xbf16>
      %c14 = arith.constant 14 : index
      %c0_42 = arith.constant 0 : index
      %c0_43 = arith.constant 0 : index
      %67 = vector.load %arg3[%c14, %c0_42, %c0_43] : memref<16x8x4xbf16, #tpu.memory_space<vmem>>, vector<1x8x4xbf16>
      %68 = vector.shape_cast %67 : vector<1x8x4xbf16> to vector<8x4xbf16>
      %cst_44 = arith.constant dense<0.000000e+00> : vector<8x8xf32>
      %69 = tpu.matmul %68, %66, %cst_44 {dimension_numbers = #tpu.dot_dimension_numbers<[1], [0], [0], [1], [0, 0, 1, 1], [], []>} : vector<8x4xbf16>, vector<4x8xbf16>, vector<8x8xf32> -> vector<8x8xf32>
      %70 = arith.addf %65, %69 : vector<8x8xf32>
      %71 = vector.broadcast %1 : vector<8x1xf32> to vector<8x8xf32>
      %72 = arith.addf %70, %71 : vector<8x8xf32>
      %73 = vector.shape_cast %72 : vector<8x8xf32> to vector<1x8x8xf32>
      %c0_45 = arith.constant 0 : index
      %74 = arith.index_cast %arg6 : i32 to index
      %c8 = arith.constant 8 : index
      %c0_46 = arith.constant 0 : index
      %75 = vector.load %arg5[%c0_45, %74, %c8, %c0_46] : memref<1x8x32x8xf32, #tpu.memory_space<vmem>>, vector<1x1x8x8xf32>
      %76 = vector.shape_cast %75 : vector<1x1x8x8xf32> to vector<1x8x8xf32>
      %77 = vector.shape_cast %73 : vector<1x8x8xf32> to vector<1x1x8x8xf32>
      tpu.vector_store %arg5[%c0_45, %74, %c8, %c0_46], %77 {strides = array<i32>} : memref<1x8x32x8xf32, #tpu.memory_space<vmem>>, vector<1x1x8x8xf32>,
      %cst_47 = arith.constant 0.000000e+00 : f32
      %78 = vector.broadcast %cst_47 : f32 to vector<8x8xf32>
      %79 = vector.extract_strided_slice %21 {offsets = [0, 1], sizes = [4, 8], strides = [1, 1]} : vector<4x10xbf16> to vector<4x8xbf16>
      %c1 = arith.constant 1 : index
      %c0_48 = arith.constant 0 : index
      %c0_49 = arith.constant 0 : index
      %80 = vector.load %arg3[%c1, %c0_48, %c0_49] : memref<16x8x4xbf16, #tpu.memory_space<vmem>>, vector<1x8x4xbf16>
      %81 = vector.shape_cast %80 : vector<1x8x4xbf16> to vector<8x4xbf16>
      %cst_50 = arith.constant dense<0.000000e+00> : vector<8x8xf32>
      %82 = tpu.matmul %81, %79, %cst_50 {dimension_numbers = #tpu.dot_dimension_numbers<[1], [0], [0], [1], [0, 0, 1, 1], [], []>} : vector<8x4xbf16>, vector<4x8xbf16>, vector<8x8xf32> -> vector<8x8xf32>
      %83 = arith.addf %78, %82 : vector<8x8xf32>
      %84 = vector.extract_strided_slice %21 {offsets = [0, 0], sizes = [4, 8], strides = [1, 1]} : vector<4x10xbf16> to vector<4x8xbf16>
      %c3 = arith.constant 3 : index
      %c0_51 = arith.constant 0 : index
      %c0_52 = arith.constant 0 : index
      %85 = vector.load %arg3[%c3, %c0_51, %c0_52] : memref<16x8x4xbf16, #tpu.memory_space<vmem>>, vector<1x8x4xbf16>
      %86 = vector.shape_cast %85 : vector<1x8x4xbf16> to vector<8x4xbf16>
      %cst_53 = arith.constant dense<0.000000e+00> : vector<8x8xf32>
      %87 = tpu.matmul %86, %84, %cst_53 {dimension_numbers = #tpu.dot_dimension_numbers<[1], [0], [0], [1], [0, 0, 1, 1], [], []>} : vector<8x4xbf16>, vector<4x8xbf16>, vector<8x8xf32> -> vector<8x8xf32>
      %88 = arith.addf %83, %87 : vector<8x8xf32>
      %89 = vector.extract_strided_slice %15 {offsets = [0, 1], sizes = [4, 8], strides = [1, 1]} : vector<4x10xbf16> to vector<4x8xbf16>
      %c9 = arith.constant 9 : index
      %c0_54 = arith.constant 0 : index
      %c0_55 = arith.constant 0 : index
      %90 = vector.load %arg3[%c9, %c0_54, %c0_55] : memref<16x8x4xbf16, #tpu.memory_space<vmem>>, vector<1x8x4xbf16>
      %91 = vector.shape_cast %90 : vector<1x8x4xbf16> to vector<8x4xbf16>
      %cst_56 = arith.constant dense<0.000000e+00> : vector<8x8xf32>
      %92 = tpu.matmul %91, %89, %cst_56 {dimension_numbers = #tpu.dot_dimension_numbers<[1], [0], [0], [1], [0, 0, 1, 1], [], []>} : vector<8x4xbf16>, vector<4x8xbf16>, vector<8x8xf32> -> vector<8x8xf32>
      %93 = arith.addf %88, %92 : vector<8x8xf32>
      %94 = vector.extract_strided_slice %15 {offsets = [0, 0], sizes = [4, 8], strides = [1, 1]} : vector<4x10xbf16> to vector<4x8xbf16>
      %c11 = arith.constant 11 : index
      %c0_57 = arith.constant 0 : index
      %c0_58 = arith.constant 0 : index
      %95 = vector.load %arg3[%c11, %c0_57, %c0_58] : memref<16x8x4xbf16, #tpu.memory_space<vmem>>, vector<1x8x4xbf16>
      %96 = vector.shape_cast %95 : vector<1x8x4xbf16> to vector<8x4xbf16>
      %cst_59 = arith.constant dense<0.000000e+00> : vector<8x8xf32>
      %97 = tpu.matmul %96, %94, %cst_59 {dimension_numbers = #tpu.dot_dimension_numbers<[1], [0], [0], [1], [0, 0, 1, 1], [], []>} : vector<8x4xbf16>, vector<4x8xbf16>, vector<8x8xf32> -> vector<8x8xf32>
      %98 = arith.addf %93, %97 : vector<8x8xf32>
      %99 = vector.broadcast %1 : vector<8x1xf32> to vector<8x8xf32>
      %100 = arith.addf %98, %99 : vector<8x8xf32>
      %101 = vector.shape_cast %100 : vector<8x8xf32> to vector<1x8x8xf32>
      %c0_60 = arith.constant 0 : index
      %102 = arith.index_cast %arg6 : i32 to index
      %c16 = arith.constant 16 : index
      %c0_61 = arith.constant 0 : index
      %103 = vector.load %arg5[%c0_60, %102, %c16, %c0_61] : memref<1x8x32x8xf32, #tpu.memory_space<vmem>>, vector<1x1x8x8xf32>
      %104 = vector.shape_cast %103 : vector<1x1x8x8xf32> to vector<1x8x8xf32>
      %105 = vector.shape_cast %101 : vector<1x8x8xf32> to vector<1x1x8x8xf32>
      tpu.vector_store %arg5[%c0_60, %102, %c16, %c0_61], %105 {strides = array<i32>} : memref<1x8x32x8xf32, #tpu.memory_space<vmem>>, vector<1x1x8x8xf32>,
      %cst_62 = arith.constant 0.000000e+00 : f32
      %106 = vector.broadcast %cst_62 : f32 to vector<8x8xf32>
      %107 = vector.extract_strided_slice %21 {offsets = [0, 2], sizes = [4, 8], strides = [1, 1]} : vector<4x10xbf16> to vector<4x8xbf16>
      %c0_63 = arith.constant 0 : index
      %c0_64 = arith.constant 0 : index
      %c0_65 = arith.constant 0 : index
      %108 = vector.load %arg3[%c0_63, %c0_64, %c0_65] : memref<16x8x4xbf16, #tpu.memory_space<vmem>>, vector<1x8x4xbf16>
      %109 = vector.shape_cast %108 : vector<1x8x4xbf16> to vector<8x4xbf16>
      %cst_66 = arith.constant dense<0.000000e+00> : vector<8x8xf32>
      %110 = tpu.matmul %109, %107, %cst_66 {dimension_numbers = #tpu.dot_dimension_numbers<[1], [0], [0], [1], [0, 0, 1, 1], [], []>} : vector<8x4xbf16>, vector<4x8xbf16>, vector<8x8xf32> -> vector<8x8xf32>
      %111 = arith.addf %106, %110 : vector<8x8xf32>
      %112 = vector.extract_strided_slice %21 {offsets = [0, 1], sizes = [4, 8], strides = [1, 1]} : vector<4x10xbf16> to vector<4x8xbf16>
      %c2 = arith.constant 2 : index
      %c0_67 = arith.constant 0 : index
      %c0_68 = arith.constant 0 : index
      %113 = vector.load %arg3[%c2, %c0_67, %c0_68] : memref<16x8x4xbf16, #tpu.memory_space<vmem>>, vector<1x8x4xbf16>
      %114 = vector.shape_cast %113 : vector<1x8x4xbf16> to vector<8x4xbf16>
      %cst_69 = arith.constant dense<0.000000e+00> : vector<8x8xf32>
      %115 = tpu.matmul %114, %112, %cst_69 {dimension_numbers = #tpu.dot_dimension_numbers<[1], [0], [0], [1], [0, 0, 1, 1], [], []>} : vector<8x4xbf16>, vector<4x8xbf16>, vector<8x8xf32> -> vector<8x8xf32>
      %116 = arith.addf %111, %115 : vector<8x8xf32>
      %117 = vector.extract_strided_slice %15 {offsets = [0, 2], sizes = [4, 8], strides = [1, 1]} : vector<4x10xbf16> to vector<4x8xbf16>
      %c8_70 = arith.constant 8 : index
      %c0_71 = arith.constant 0 : index
      %c0_72 = arith.constant 0 : index
      %118 = vector.load %arg3[%c8_70, %c0_71, %c0_72] : memref<16x8x4xbf16, #tpu.memory_space<vmem>>, vector<1x8x4xbf16>
      %119 = vector.shape_cast %118 : vector<1x8x4xbf16> to vector<8x4xbf16>
      %cst_73 = arith.constant dense<0.000000e+00> : vector<8x8xf32>
      %120 = tpu.matmul %119, %117, %cst_73 {dimension_numbers = #tpu.dot_dimension_numbers<[1], [0], [0], [1], [0, 0, 1, 1], [], []>} : vector<8x4xbf16>, vector<4x8xbf16>, vector<8x8xf32> -> vector<8x8xf32>
      %121 = arith.addf %116, %120 : vector<8x8xf32>
      %122 = vector.extract_strided_slice %15 {offsets = [0, 1], sizes = [4, 8], strides = [1, 1]} : vector<4x10xbf16> to vector<4x8xbf16>
      %c10 = arith.constant 10 : index
      %c0_74 = arith.constant 0 : index
      %c0_75 = arith.constant 0 : index
      %123 = vector.load %arg3[%c10, %c0_74, %c0_75] : memref<16x8x4xbf16, #tpu.memory_space<vmem>>, vector<1x8x4xbf16>
      %124 = vector.shape_cast %123 : vector<1x8x4xbf16> to vector<8x4xbf16>
      %cst_76 = arith.constant dense<0.000000e+00> : vector<8x8xf32>
      %125 = tpu.matmul %124, %122, %cst_76 {dimension_numbers = #tpu.dot_dimension_numbers<[1], [0], [0], [1], [0, 0, 1, 1], [], []>} : vector<8x4xbf16>, vector<4x8xbf16>, vector<8x8xf32> -> vector<8x8xf32>
      %126 = arith.addf %121, %125 : vector<8x8xf32>
      %127 = vector.broadcast %1 : vector<8x1xf32> to vector<8x8xf32>
      %128 = arith.addf %126, %127 : vector<8x8xf32>
      %129 = vector.shape_cast %128 : vector<8x8xf32> to vector<1x8x8xf32>
      %c0_77 = arith.constant 0 : index
      %130 = arith.index_cast %arg6 : i32 to index
      %c24 = arith.constant 24 : index
      %c0_78 = arith.constant 0 : index
      %131 = vector.load %arg5[%c0_77, %130, %c24, %c0_78] : memref<1x8x32x8xf32, #tpu.memory_space<vmem>>, vector<1x1x8x8xf32>
      %132 = vector.shape_cast %131 : vector<1x1x8x8xf32> to vector<1x8x8xf32>
      %133 = vector.shape_cast %129 : vector<1x8x8xf32> to vector<1x1x8x8xf32>
      tpu.vector_store %arg5[%c0_77, %130, %c24, %c0_78], %133 {strides = array<i32>} : memref<1x8x32x8xf32, #tpu.memory_space<vmem>>, vector<1x1x8x8xf32>,
    }
    %c8_i32_2 = arith.constant 8 : i32
    return
  }
  func.func @transform_0(%arg0: i32, %arg1: i32) -> (i32, i32, i32, i32) {
    %c0_i32 = arith.constant 0 : i32
    %c0_i32_0 = arith.constant 0 : i32
    %c0_i32_1 = arith.constant 0 : i32
    %c0_i32_2 = arith.constant 0 : i32
    return %arg0, %c0_i32, %c0_i32_0, %c0_i32_1 : i32, i32, i32, i32
  }
  func.func @transform_1(%arg0: i32, %arg1: i32) -> (i32, i32, i32) {
    %c0_i32 = arith.constant 0 : i32
    %c0_i32_0 = arith.constant 0 : i32
    %c0_i32_1 = arith.constant 0 : i32
    %c0_i32_2 = arith.constant 0 : i32
    return %c0_i32, %c0_i32_0, %c0_i32_1 : i32, i32, i32
  }
  func.func @transform_2(%arg0: i32, %arg1: i32) -> (i32, i32) {
    %c0_i32 = arith.constant 0 : i32
    %c0_i32_0 = arith.constant 0 : i32
    %c0_i32_1 = arith.constant 0 : i32
    return %c0_i32, %c0_i32_0 : i32, i32
  }
  func.func @transform_3(%arg0: i32, %arg1: i32) -> (i32, i32, i32, i32) {
    %c0_i32 = arith.constant 0 : i32
    %c0_i32_0 = arith.constant 0 : i32
    %c0_i32_1 = arith.constant 0 : i32
    return %arg0, %arg1, %c0_i32, %c0_i32_0 : i32, i32, i32, i32
  }
}

</mosaic_0001>

<bundles_post_ra>
// kernel: conv_transpose2d_same.1
= control target key start
LH: loop header
LB: loop body
LE: loop exit
PB: predicated region body
PF: predicated region fallthrough
CT: control target
= control target key end

     0   :  { %s1407_s12 = smov 0   ;;  %s1409_s13 = smov 0   ;;  %s1609_s0 = inlined_call_operand.vmem [shape: bf16[2,10,4,10], index: 0, kind: input, shape index: {}]   ;;  %s1610_s1 = inlined_call_operand.vmem [shape: bf16[16,8,4], index: 1, kind: input, shape index: {}]   ;;  %s1611_s2 = inlined_call_operand.vmem [shape: f32[8,1], index: 2, kind: input, shape index: {}]   ;;  %s1612_s3 = inlined_call_operand.vmem [shape: f32[2,8,32,8], index: 3, kind: output, shape index: {}]  }
   0x1   :  { %s1411_s14 = smov 0  }
   0x2 LB: > { %s25_s15 = sadd.s32 1, %s1371_s13  ;;  %p1137_p0 = scmp.ge.s32.totalorder %s1375_s14, 1  ;;  %s1375_s14 = sphi %s1411_s14, %s13_s14   ;;  %s1371_s13 = sphi %s1409_s13, %s1614_s13   ;;  %s1367_s12 = sphi %s1407_s12, %s1613_s12  }
   0x3   : > { %p27_p1 = scmp.ge.s32.totalorder %s25_s15, 2  ;;  %p151_p2 = scmp.lt.s32.totalorder %s1375_s14, 3 }
   0x5   : > { %s1616_s15 = smov (%p27_p1, %s25_s15), 0  ;;  %p152_p3 = pnand %p1137_p0, %p151_p2 }
   0x6   : > { %p180_p4 = scmp.lt.s32.totalorder (!%p152_p3), %s1367_s12, 1  ;;  %s1440_s26 = smov (!%p152_p3), 0  }
   0x7   : > { %155 = sbr.rel (%p152_p3) target bundleno = 399 (0x18f), region = 32 }
   0xc   : > { %v1428_v0 = vld [vmem:[%s1611_s2] sm:$0xff]  ;;  %s1618_s12 = smov (!%p180_p4, %s1367_s12), 1 }
   0xd   : > { %s1309_s18 = smul.u32 20, %s1618_s12  ;;  %s1180_s19 = sshll.u32 %s1618_s12, 8 }
   0xe   : > { %s1433_s22 = scalar_lea.vmem %s1612_s3, %s1180_s19 }
   0xf   : > { %s1438_s25 = scalar_lea.vmem %s1609_s0, %s1309_s18 }
  0x10 LB: >> { %v273_v1 = vlaneseq  ;;  %v1381_v2 = vmov 1983009808   ;;  %v1382_v4 = vmov 0.0   ;;  %s1141_s27 = sshll.u32 %s1379_s26, 1  ;;  %vm225_vm0 = vcmask 1041408   ;;  %s1384_s4 = smov 127   ;;  %s1379_s26 = sphi %s1440_s26, %s204_s26  }
  0x11   : >> { %v271_v3 = vunpack.c.l.s4 %v1381_v2  ;;  %1213 = vmatprep.subr.bf16.mxu0 %v1382_v4  ;;  %1219 = vmatprep.subr.bf16.mxu1 %v1382_v4  ;;  %vm1383_vm1 = vmmov 0   ;;  %s207_s28 = scalar_lea.vmem %s1438_s25, %s1141_s27  ;;  %v1147_v12 = vld [vmem:[%s1610_s1 + $0x1c] sm:$0xf]  ;;  %vm221_vm2 = vcmask 31744   ;;  %s1385_s5 = smov 126   ;;  %v1386_v16 = vmov 0  }
  0x12   : >> { %v274_v5 = vshrl.u32 %v273_v1, 7  ;;  %1215 = vmatprep.mubr.msk.bf16.mxu0 %vm1383_vm1, %v1382_v4  ;;  %1221 = vmatprep.mubr.msk.bf16.mxu1 %vm1383_vm1, %v1382_v4  ;;  %v1143_v7 = vld [vmem:[%s207_s28 + $0x2] sm:$0x3]  ;;  %v208_v10 = vld [vmem:[%s207_s28] sm:$0x3]  ;;  %s1154_s18 = sshll.u32 %s1379_s26, 5 }
  0x13   : >> { %v272_v6 = vunpack.c.0.s8 %v271_v3  ;;  %v1454_v9 = vsel %vm225_vm0, %v1143_v7, 0  ;;  %v1145_v14 = vld [vmem:[%s207_s28 + $0x4] sm:$0x3]  ;;  %1348 = vset.pattern.permute.xlu0 %v1386_v16  ;;  %v1146_v19 = vld [vmem:[%s1610_s1 + $0x14] sm:$0xf]  ;;  %v390_v20 = vsel %vm225_vm0, %v208_v10, 0  ;;  %s1583_s19 = scalar_lea.vmem %s1433_s22, %s1154_s18 }
  0x14   : >> { %1214 = vmatpush3.bf16.msra.mxu0 %v1454_v9  ;;  %v1150_v23 = vld [vmem:[%s1610_s1 + $0x34] sm:$0xf]  ;;  %v1152_v25 = vld [vmem:[%s1610_s1 + $0x3c] sm:$0xf]  ;;  %v1156_v28 = vld [vmem:[%s1610_s1 + $0x18] sm:$0xf] }
  0x15   : >> { %v275_v8 = vsub.s32 %v272_v6, %v274_v5  ;;  %1225 = vmatprep.subr.bf16.mxu0 %v1382_v4  ;;  %v1155_v30 = vld [vmem:[%s1610_s1 + $0x10] sm:$0xf]  ;;  %v645_v32 = vsel %vm225_vm0, %v1145_v14, 0  ;;  %v1161_v34 = vld [vmem:[%s1610_s1 + $0x38] sm:$0xf]  ;;  %vm441_vm3 = vcmask 64512  }
  0x16   : >> { %v1159_v31 = vld [vmem:[%s1610_s1 + $0x30] sm:$0xf]  ;;  %v1164_v36 = vld [vmem:[%s1610_s1 + $0xc] sm:$0xf]  ;;  %v1163_v37 = vld [vmem:[%s1610_s1 + $0x4] sm:$0xf] }
  0x17   : >> { %v276_v11 = vrot.slane %v1143_v7, %v275_v8  ;;  %v334_v13 = vrot.slane %v208_v10, %v275_v8  ;;  %1216 = vmatmul.mubr.msk.bf16.vlgmr.msra.gmra.mxu0 %vm221_vm2, %v1147_v12  ;;  %v694_v15 = vrot.slane %v1145_v14, %v275_v8  ;;  %v1167_v38 = vld [vmem:[%s1610_s1 + $0x24] sm:$0xf]  ;;  %v1169_v40 = vld [vmem:[%s1610_s1 + $0x2c] sm:$0xf]  ;;  %v1171_v42 = vld [vmem:[%s1610_s1 + $0x8] sm:$0xf] }
  0x18   : >> { %1227 = vmatprep.mubr.msk.bf16.mxu0 %vm1383_vm1, %v1382_v4  ;;  %v837_v43 = vld [vmem:[%s1610_s1] sm:$0xf]  ;;  %v1176_v45 = vld [vmem:[%s1610_s1 + $0x28] sm:$0xf]  ;;  %s204_s26 = sadd.s32 1, %s1379_s26  }
  0x19   : >> { %277 = vrot.lane.b32.xlu0 %v276_v11, %s1384_s4  ;;  %490 = vrot.lane.b32.xlu1 %v276_v11, %s1385_s5  ;;  %v1174_v44 = vld [vmem:[%s1610_s1 + $0x20] sm:$0xf]  ;;  %p201_p5 = scmp.ge.s32.totalorder %s204_s26, 8  }
  0x1d   : >> { %335 = vrot.lane.b32.xlu0 %v334_v13, %s1384_s4  ;;  %540 = vrot.lane.b32.xlu1 %v334_v13, %s1385_s5 }
  0x21   : >> { %695 = vrot.lane.b32.xlu0 %v694_v15, %s1384_s4  ;;  %883 = vrot.lane.b32.xlu1 %v694_v15, %s1385_s5 }
  0x25   : >> { %435 = vperm.xlu0 %1348, %v1428_v0  }
  0x8b   : >> { %v278_v17 = vpop.permute.xlu0 %277  ;;  %v491_v24 = vpop.permute.xlu1 %490 }
  0x8c   : >> { %v1466_v18 = vsel %vm225_vm0, %v278_v17, 0  ;;  %v496_v26 = vsel %vm225_vm0, %v491_v24, 0 }
  0x8d   : >> { %1220 = vmatpush3.bf16.msra.mxu1 %v1466_v18 }
  0x8e   : >> { %1231 = vmatprep.subr.bf16.mxu1 %v1382_v4 }
  0x8f   : >> { %v336_v21 = vpop.permute.xlu0 %335  ;;  %v541_v27 = vpop.permute.xlu1 %540 }
  0x90   : >> { %v341_v22 = vsel %vm225_vm0, %v336_v21, 0  ;;  %1222 = vmatmul.mubr.msk.bf16.vlgmr.msra.gmra.mxu1 %vm221_vm2, %v1146_v19  ;;  %v546_v29 = vsel %vm225_vm0, %v541_v27, 0 }
  0x91   : >> { %1226 = vmatpush3.bf16.msra.mxu0 %v341_v22  ;;  %1232 = vmatpush3.bf16.msra.mxu1 %v390_v20 }
  0x92   : >> { %1237 = vmatprep.subr.bf16.mxu0 %v1382_v4  ;;  %1233 = vmatprep.mubr.msk.bf16.mxu1 %vm1383_vm1, %v1382_v4 }
  0x93   : >> { %1243 = vmatprep.subr.bf16.mxu1 %v1382_v4  ;;  %v696_v33 = vpop.permute.xlu0 %695  ;;  %v884_v39 = vpop.permute.xlu1 %883 }
  0x94   : >> { %1228 = vmatmul.mubr.msk.bf16.vlgmr.msra.gmra.mxu0 %vm221_vm2, %v1150_v23  ;;  %v701_v35 = vsel %vm225_vm0, %v696_v33, 0  ;;  %v889_v41 = vsel %vm225_vm0, %v884_v39, 0 }
  0x95   : >> { %1238 = vmatpush3.bf16.msra.mxu0 %v1466_v18  ;;  %1239 = vmatprep.mubr.msk.bf16.mxu0 %vm1383_vm1, %v1382_v4 }
  0x96   : >> { %1249 = vmatprep.subr.bf16.mxu0 %v1382_v4 }
  0x98   : >> { %1234 = vmatmul.mubr.msk.bf16.vlgmr.msra.gmra.mxu1 %vm221_vm2, %v1152_v25 }
  0x99   : >> { %1244 = vmatpush3.bf16.msra.mxu1 %v496_v26  ;;  %1245 = vmatprep.mubr.msk.bf16.mxu1 %vm1383_vm1, %v1382_v4 }
  0x9a   : >> { %1255 = vmatprep.subr.bf16.mxu1 %v1382_v4 }
  0x9c   : >> { %1240 = vmatmul.mubr.msk.bf16.vlgmr.msra.gmra.mxu0 %vm221_vm2, %v1156_v28 }
  0x9d   : >> { %1250 = vmatpush3.bf16.msra.mxu0 %v546_v29  ;;  %1251 = vmatprep.mubr.msk.bf16.mxu0 %vm1383_vm1, %v1382_v4 }
  0x9e   : >> { %1261 = vmatprep.subr.bf16.mxu0 %v1382_v4 }
  0xa0   : >> { %1246 = vmatmul.mubr.msk.bf16.vlgmr.msra.gmra.mxu1 %vm221_vm2, %v1155_v30  ;;  %v1580_v58 = vpop.permute.xlu0 %435 }
  0xa1   : >> { %1256 = vmatpush3.bf16.msra.mxu1 %v341_v22  ;;  %1257 = vmatprep.mubr.msk.bf16.mxu1 %vm1383_vm1, %v1382_v4 }
  0xa2   : >> { %1267 = vmatprep.subr.bf16.mxu1 %v1382_v4 }
  0xa4   : >> { %1252 = vmatmul.mubr.msk.bf16.vlgmr.msra.gmra.mxu0 %vm221_vm2, %v1159_v31 }
  0xa5   : >> { %1262 = vmatpush3.bf16.msra.mxu0 %v645_v32  ;;  %1263 = vmatprep.mubr.msk.bf16.mxu0 %vm1383_vm1, %v1382_v4 }
  0xa6   : >> { %1273 = vmatprep.subr.bf16.mxu0 %v1382_v4 }
  0xa8   : >> { %1258 = vmatmul.mubr.msk.bf16.vlgmr.msra.gmra.mxu1 %vm221_vm2, %v1161_v34 }
  0xa9   : >> { %1268 = vmatpush3.bf16.msra.mxu1 %v701_v35  ;;  %1269 = vmatprep.mubr.msk.bf16.mxu1 %vm1383_vm1, %v1382_v4 }
  0xaa   : >> { %1279 = vmatprep.subr.bf16.mxu1 %v1382_v4 }
  0xac   : >> { %1264 = vmatmul.mubr.msk.bf16.vlgmr.msra.gmra.mxu0 %vm221_vm2, %v1164_v36 }
  0xad   : >> { %1274 = vmatpush3.bf16.msra.mxu0 %v1466_v18  ;;  %1275 = vmatprep.mubr.msk.bf16.mxu0 %vm1383_vm1, %v1382_v4 }
  0xae   : >> { %1285 = vmatprep.subr.bf16.mxu0 %v1382_v4 }
  0xb0   : >> { %1270 = vmatmul.mubr.msk.bf16.vlgmr.msra.gmra.mxu1 %vm221_vm2, %v1163_v37 }
  0xb1   : >> { %1280 = vmatpush3.bf16.msra.mxu1 %v1454_v9  ;;  %1281 = vmatprep.mubr.msk.bf16.mxu1 %vm1383_vm1, %v1382_v4 }
  0xb2   : >> { %1291 = vmatprep.subr.bf16.mxu1 %v1382_v4 }
  0xb4   : >> { %1276 = vmatmul.mubr.msk.bf16.vlgmr.msra.gmra.mxu0 %vm221_vm2, %v1167_v38 }
  0xb5   : >> { %1286 = vmatpush3.bf16.msra.mxu0 %v701_v35  ;;  %1287 = vmatprep.mubr.msk.bf16.mxu0 %vm1383_vm1, %v1382_v4 }
  0xb6   : >> { %1297 = vmatprep.subr.bf16.mxu0 %v1382_v4 }
  0xb8   : >> { %1282 = vmatmul.mubr.msk.bf16.vlgmr.msra.gmra.mxu1 %vm221_vm2, %v1169_v40 }
  0xb9   : >> { %1292 = vmatpush3.bf16.msra.mxu1 %v889_v41  ;;  %1293 = vmatprep.mubr.msk.bf16.mxu1 %vm1383_vm1, %v1382_v4 }
  0xba   : >> { %1303 = vmatprep.subr.bf16.mxu1 %v1382_v4 }
  0xbc   : >> { %1288 = vmatmul.mubr.msk.bf16.vlgmr.msra.gmra.mxu0 %vm221_vm2, %v1171_v42 }
  0xbd   : >> { %1298 = vmatpush3.bf16.msra.mxu0 %v496_v26  ;;  %1299 = vmatprep.mubr.msk.bf16.mxu0 %vm1383_vm1, %v1382_v4 }
  0xc0   : >> { %1294 = vmatmul.mubr.msk.bf16.vlgmr.msra.gmra.mxu1 %vm221_vm2, %v837_v43 }
  0xc1   : >> { %1304 = vmatpush3.bf16.msra.mxu1 %v1466_v18  ;;  %1305 = vmatprep.mubr.msk.bf16.mxu1 %vm1383_vm1, %v1382_v4 }
  0xc4   : >> { %1300 = vmatmul.mubr.msk.bf16.vlgmr.msra.gmra.mxu0 %vm221_vm2, %v1174_v44 }
  0xc8   : >> { %1306 = vmatmul.mubr.msk.bf16.vlgmr.msra.gmra.mxu1 %vm221_vm2, %v1176_v45 }
  0xd7   : >> { %v263_v46 = vpop.f32.mrf.mxu0 }
  0xd9   : >> { %v1217_v47 = vpop.f32.mrf.mxu0 }
  0xdb   : >> { %v266_v48 = vpop.f32.mrf.mxu0 }
  0xdd   : >> { %v1218_v49 = vpop.f32.mrf.mxu0 }
 0x150   : >> { %v319_v50 = vpop.f32.mrf.mxu1 }
 0x151   : >> { %v320_v54 = vadd.f32 %v319_v50, %v263_v46 }
 0x152   : >> { %v1223_v51 = vpop.f32.mrf.mxu1 }
 0x154   : >> { %v322_v52 = vpop.f32.mrf.mxu1  ;;  %v377_v53 = vpop.f32.mrf.mxu0 }
 0x155   : >> { %v383_v57 = vadd.f32 %v377_v53, %v320_v54 }
 0x156   : >> { %v1224_v55 = vpop.f32.mrf.mxu1  ;;  %v1229_v56 = vpop.f32.mrf.mxu0 }
 0x158   : >> { %v380_v59 = vpop.f32.mrf.mxu0  ;;  %v426_v60 = vpop.f32.mrf.mxu1 }
 0x159   : >> { %v432_v61 = vadd.f32 %v426_v60, %v383_v57 }
 0x15a   : >> { %v1230_v62 = vpop.f32.mrf.mxu0  ;;  %v1235_v63 = vpop.f32.mrf.mxu1 }
 0x15b   : >> { %v438_v1 = vadd.f32 %v1580_v58, %v432_v61 }
 0x15c   : >> { %v429_v2 = vpop.f32.mrf.mxu1  ;;  %v484_v3 = vpop.f32.mrf.mxu0 }
 0x15d   : >> { %442 = vst.msk [vmem:[%s1583_s19] sm:$0xff] %vm441_vm3, %v438_v1 }
 0x15e   : >> { %v1236_v4 = vpop.f32.mrf.mxu1  ;;  %v1241_v5 = vpop.f32.mrf.mxu0 }
 0x160   : >> { %v487_v6 = vpop.f32.mrf.mxu0  ;;  %v532_v7 = vpop.f32.mrf.mxu1 }
 0x161   : >> { %v533_v12 = vadd.f32 %v532_v7, %v484_v3 }
 0x162   : >> { %v1242_v8 = vpop.f32.mrf.mxu0  ;;  %v1247_v9 = vpop.f32.mrf.mxu1 }
 0x164   : >> { %v535_v10 = vpop.f32.mrf.mxu1  ;;  %v582_v11 = vpop.f32.mrf.mxu0 }
 0x165   : >> { %v588_v15 = vadd.f32 %v582_v11, %v533_v12 }
 0x166   : >> { %v1248_v13 = vpop.f32.mrf.mxu1  ;;  %v1253_v14 = vpop.f32.mrf.mxu0 }
 0x168   : >> { %v585_v16 = vpop.f32.mrf.mxu0  ;;  %v628_v17 = vpop.f32.mrf.mxu1 }
 0x169   : >> { %v634_v18 = vadd.f32 %v628_v17, %v588_v15 }
 0x16a   : >> { %v1254_v19 = vpop.f32.mrf.mxu0  ;;  %v1259_v20 = vpop.f32.mrf.mxu1 }
 0x16b   : >> { %v635_v21 = vadd.f32 %v634_v18, %v1580_v58 }
 0x16c   : >> { %v631_v22 = vpop.f32.mrf.mxu1  ;;  %v681_v23 = vpop.f32.mrf.mxu0 }
 0x16d   : >> { %636 = vst.msk [vmem:[%s1583_s19 + $0x8] sm:$0xff] %vm441_vm3, %v635_v21 }
 0x16e   : >> { %v1260_v24 = vpop.f32.mrf.mxu1  ;;  %v1265_v25 = vpop.f32.mrf.mxu0 }
 0x170   : >> { %v684_v26 = vpop.f32.mrf.mxu0  ;;  %v737_v27 = vpop.f32.mrf.mxu1 }
 0x171   : >> { %v738_v32 = vadd.f32 %v737_v27, %v681_v23 }
 0x172   : >> { %v1266_v28 = vpop.f32.mrf.mxu0  ;;  %v1271_v29 = vpop.f32.mrf.mxu1 }
 0x174   : >> { %v740_v30 = vpop.f32.mrf.mxu1  ;;  %v782_v31 = vpop.f32.mrf.mxu0 }
 0x175   : >> { %v788_v35 = vadd.f32 %v782_v31, %v738_v32 }
 0x176   : >> { %v1272_v33 = vpop.f32.mrf.mxu1  ;;  %v1277_v34 = vpop.f32.mrf.mxu0 }
 0x178   : >> { %v785_v36 = vpop.f32.mrf.mxu0  ;;  %v828_v37 = vpop.f32.mrf.mxu1 }
 0x179   : >> { %v834_v38 = vadd.f32 %v828_v37, %v788_v35 }
 0x17a   : >> { %v1278_v39 = vpop.f32.mrf.mxu0  ;;  %v1283_v40 = vpop.f32.mrf.mxu1 }
 0x17b   : >> { %v835_v41 = vadd.f32 %v834_v38, %v1580_v58 }
 0x17c   : >> { %v831_v42 = vpop.f32.mrf.mxu1  ;;  %v877_v43 = vpop.f32.mrf.mxu0 }
 0x17d   : >> { %836 = vst.msk [vmem:[%s1583_s19 + $0x10] sm:$0xff] %vm441_vm3, %v835_v41 }
 0x17e   : >> { %v1284_v44 = vpop.f32.mrf.mxu1  ;;  %v1289_v45 = vpop.f32.mrf.mxu0 }
 0x180   : >> { %v880_v46 = vpop.f32.mrf.mxu0  ;;  %v925_v47 = vpop.f32.mrf.mxu1 }
 0x181   : >> { %v926_v52 = vadd.f32 %v925_v47, %v877_v43 }
 0x182   : >> { %v1290_v48 = vpop.f32.mrf.mxu0  ;;  %v1295_v49 = vpop.f32.mrf.mxu1 }
 0x184   : >> { %v928_v50 = vpop.f32.mrf.mxu1  ;;  %v970_v51 = vpop.f32.mrf.mxu0 }
 0x185   : >> { %v976_v55 = vadd.f32 %v970_v51, %v926_v52 }
 0x186   : >> { %v1296_v53 = vpop.f32.mrf.mxu1  ;;  %v1301_v54 = vpop.f32.mrf.mxu0 }
 0x188   : >> { %v973_v56 = vpop.f32.mrf.mxu0  ;;  %v1016_v57 = vpop.f32.mrf.mxu1 }
 0x189   : >> { %v1022_v59 = vadd.f32 %v1016_v57, %v976_v55 }
 0x18a   : >> { %v1302_v60 = vpop.f32.mrf.mxu0  ;;  %v1307_v61 = vpop.f32.mrf.mxu1  ;;  %203 = sbr.rel (!%p201_p5) target bundleno = 16 (0x10), region = 88 }
 0x18b   : >> { %v1023_v62 = vadd.f32 %v1022_v59, %v1580_v58 }
 0x18c   : >> { %v1019_v63 = vpop.f32.mrf.mxu1 }
 0x18d   : >> { %1024 = vst.msk [vmem:[%s1583_s19 + $0x18] sm:$0xff] %vm441_vm3, %v1023_v62 }
 0x18e   : >> { %v1308_v1 = vpop.f32.mrf.mxu1 }
 0x18f PF: > { %s13_s14 = sadd.s32 1, %s1375_s14   ;;  %s1613_s12 = smov %s1371_s13 }
 0x190   : > { %p10_p6 = scmp.ge.s32.totalorder %s13_s14, 4   ;;  %s1614_s13 = smov %s1616_s15 }
 0x192   :  { %12 = sbr.rel (!%p10_p6) target bundleno = 2 (0x2), region = 99 }

</bundles_post_ra>
